<compile_context>
chip_gen: v7x
topology: tpu7x:2x2x1
jax: 0.10.0
libtpu: 0.0.40
codegen_flags: <defaults>
</compile_context>

<pallas_src>
import numpy as np
import jax
import jax.numpy as jnp
from jax.experimental import pallas as pl
from jax.experimental.pallas import tpu as pltpu

# ----------------------------- model config ---------------------------------
X_DIM = 128              # x_dim (lane-aligned / MXU friendly)
C_DIM = 8                # c_dim == z_dim
M_DIMS = [32, 64]        # m_dims
LOG_VAR_X = 0.0          # BaseVAE log_var_x

LANE = 128
SUBLANE = 8
MAX_TILE_B = 1024        # largest batch tile (512 KiB f32 slab, << VMEM caps)
W_DTYPE = jnp.bfloat16   # MXU-native weight / dot-operand dtype

# Layers in execution order: encoder (x_dim -> m_dims[::-1] -> 2*c_dim),
# then decoder (c_dim -> m_dims -> x_dim). ReLU between all but the last of
# each stack (matches the PyTorch Encoder/Decoder construction).
ENC_DIMS = [X_DIM] + M_DIMS[::-1] + [2 * C_DIM]      # 128 -> 64 -> 32 -> 16
DEC_DIMS = [C_DIM] + M_DIMS + [X_DIM]                # 8 -> 32 -> 64 -> 128
LAYER_IN = ENC_DIMS[:-1] + DEC_DIMS[:-1]             # [128, 64, 32, 8, 32, 64]
LAYER_OUT = ENC_DIMS[1:] + DEC_DIMS[1:]              # [64, 32, 16, 32, 64, 128]
LAYER_RELU = [True, True, False, True, True, False]
N_LAYERS = len(LAYER_IN)
B_ROWS = 8                                           # bias slab rows (>= N_LAYERS)

assert X_DIM == LANE and 2 * C_DIM <= LANE
assert max(LAYER_IN) <= LANE and max(LAYER_OUT) <= LANE
assert N_LAYERS <= B_ROWS


def _num_tensorcores():
    """Heuristic TC count per device (only affects tiling, not correctness)."""
    try:
        kind = jax.devices()[0].device_kind.lower()
    except Exception:
        return 1
    if "v7" in kind or "v4" in kind or "v5p" in kind or "v5 p" in kind:
        return 2
    return 1


NUM_TC = _num_tensorcores()


def _choose_tiling(batch):
    """Few, large tiles on 1-TC chips; >= NUM_TC tiles on multi-TC chips."""
    b8 = ((batch + SUBLANE - 1) // SUBLANE) * SUBLANE
    steps = max(NUM_TC, (b8 + MAX_TILE_B - 1) // MAX_TILE_B)
    tile = -(-b8 // steps)
    tile = ((tile + SUBLANE - 1) // SUBLANE) * SUBLANE
    return tile, steps, tile * steps


# ------------------------------- kernel -------------------------------------
def gmmvae_fused_kernel(x_ref, w_ref, b_ref, mu_x_ref, enc_ref):
    """x_ref    : (TILE_B, 128)       input tile.
       w_ref    : (6, 128, 128) bf16  zero-padded weight blocks (rows >= kin == 0).
       b_ref    : (8, 128) f32        row i = layer i bias, zero padded.
       mu_x_ref : (TILE_B, 128)       sigmoid(decoder(c)).
       enc_ref  : (TILE_B, 16) f32    [mu_c | log_var_c].
    """

    def layer(h, idx):
        # Full 128-deep MXU pass; zero weight rows above LAYER_IN[idx] make any
        # stale lanes of `h` irrelevant, so no lane slicing is needed.
        y = jnp.dot(h.astype(W_DTYPE), w_ref[idx],
                    preferred_element_type=jnp.float32)
        y = y + b_ref[idx:idx + 1, :]                # (1, 128) f32 broadcast
        if LAYER_RELU[idx]:
            y = jnp.maximum(y, 0.0)
        return y

    h = x_ref[...].astype(jnp.float32)

    # --- encoder ---
    h = layer(h, 0)
    h = layer(h, 1)
    enc = layer(h, 2)                                # lanes 16..127 are exactly 0
    enc_ref[...] = enc[:, :2 * C_DIM].astype(enc_ref.dtype)

    # --- reparameterize (eval): c = mu_c.  The first decoder block has zero
    # rows above C_DIM, so the log_var lanes are killed inside the matmul.
    h = layer(enc, 3)
    h = layer(h, 4)
    h = layer(h, 5)                                  # decoder output, x_dim = 128

    # sigmoid with EUP-routed exp + approximate reciprocal
    mu_x_ref[...] = pl.reciprocal(1.0 + jnp.exp(-h),
                                  approx=True).astype(mu_x_ref.dtype)


# --------------------------- param packing (once) ----------------------------
def init_params(key):
    """nn.Linear-style init, layers in execution order (enc0..enc2, dec0..dec2).
    Weights stored (in_features, out_features) so y = x @ W + b."""
    params = []
    for i in range(N_LAYERS):
        fan_in, fan_out = LAYER_IN[i], LAYER_OUT[i]
        key, kw, kb = jax.random.split(key, 3)
        bound = 1.0 / np.sqrt(fan_in)
        w = jax.random.uniform(kw, (fan_in, fan_out), jnp.float32, -bound, bound)
        b = jax.random.uniform(kb, (fan_out,), jnp.float32, -bound, bound)
        params.append((w, b))
    return params


def pack_params(params):
    """Called ONCE at init.  Each layer becomes a zero-padded (128, 128) bf16
    block; rows >= LAYER_IN[i] and cols >= LAYER_OUT[i] are exactly zero."""
    w_packed = np.zeros((N_LAYERS, LANE, LANE), np.float32)
    b_packed = np.zeros((B_ROWS, LANE), np.float32)
    for i, (w, b) in enumerate(params):
        kin, kout = LAYER_IN[i], LAYER_OUT[i]
        w_packed[i, :kin, :kout] = np.asarray(w)
        b_packed[i, :kout] = np.asarray(b)
    return jnp.asarray(w_packed, W_DTYPE), jnp.asarray(b_packed, jnp.float32)


# ------------------------------- forward -------------------------------------
@jax.jit
def gmmvae_forward(x, w_packed, b_packed):
    """x: (B, X_DIM) -> ((mu_c, log_var_c), (mu_x, log_var_x), c)."""
    B = x.shape[0]
    assert x.shape[1] == X_DIM
    tile_b, steps, b_pad = _choose_tiling(B)
    x_p = x if b_pad == B else jnp.pad(x, ((0, b_pad - B), (0, 0)))

    itemsize = jnp.dtype(x.dtype).itemsize
    cost = pl.CostEstimate(
        flops=2 * b_pad * LANE * LANE * N_LAYERS,
        transcendentals=2 * b_pad * LANE,                  # exp + reciprocal
        bytes_accessed=(b_pad * X_DIM * itemsize           # x in
                        + N_LAYERS * LANE * LANE * 2       # W (bf16)
                        + B_ROWS * LANE * 4                # b
                        + b_pad * X_DIM * itemsize         # mu_x out
                        + b_pad * 2 * C_DIM * 4))          # enc out

    mu_x, enc = pl.pallas_call(
        gmmvae_fused_kernel,
        out_shape=(jax.ShapeDtypeStruct((b_pad, X_DIM), x.dtype),
                   jax.ShapeDtypeStruct((b_pad, 2 * C_DIM), jnp.float32)),
        grid_spec=pltpu.PrefetchScalarGridSpec(
            num_scalar_prefetch=0,
            grid=(steps,),
            in_specs=[
                pl.BlockSpec((tile_b, X_DIM), lambda i: (i, 0)),
                pl.BlockSpec((N_LAYERS, LANE, LANE), lambda i: (0, 0, 0)),  # resident
                pl.BlockSpec((B_ROWS, LANE), lambda i: (0, 0)),             # resident
            ],
            out_specs=[
                pl.BlockSpec((tile_b, X_DIM), lambda i: (i, 0)),
                pl.BlockSpec((tile_b, 2 * C_DIM), lambda i: (i, 0)),
            ],
        ),
        compiler_params=pltpu.CompilerParams(
            dimension_semantics=("parallel",)),
        cost_estimate=cost,
    )(x_p, w_packed, b_packed)

    mu_c = enc[:B, :C_DIM]
    log_var_c = enc[:B, C_DIM:2 * C_DIM]
    c = mu_c                                     # eval-mode reparameterize
    return (mu_c, log_var_c), (mu_x[:B], jnp.float32(LOG_VAR_X)), c


# ------------------------------ reference ------------------------------------
def reference_forward(x, params):
    """Pure-JAX reference, matmuls in bf16 with f32 accumulation (same policy
    as the kernel)."""
    def lin(h, w, b):
        return jnp.dot(h.astype(W_DTYPE), jnp.asarray(w, W_DTYPE),
                       preferred_element_type=jnp.float32) + b

    h = x.astype(jnp.float32)
    for i in range(3):                           # encoder
        w, b = params[i]
        h = lin(h, w, b)
        if LAYER_RELU[i]:
            h = jnp.maximum(h, 0.0)
    mu_c, log_var_c = h[:, :C_DIM], h[:, C_DIM:2 * C_DIM]
    c = mu_c                                     # eval-mode reparameterize
    h = c
    for i in range(3, 6):                        # decoder
        w, b = params[i]
        h = lin(h, w, b)
        if LAYER_RELU[i]:
            h = jnp.maximum(h, 0.0)
    mu_x = 1.0 / (1.0 + jnp.exp(-h))
    return mu_c, log_var_c, mu_x, c


# --------------------------------- main ---------------------------------------
if __name__ == "__main__":
    key = jax.random.PRNGKey(0)
    kx, kp = jax.random.split(key)
    batch = 64                                           # small example batch
    x = jax.random.uniform(kx, (batch, X_DIM), jnp.float32)   # image-like in [0,1]

    params = init_params(kp)
    w_packed, b_packed = pack_params(params)             # packed ONCE

    (mu_c, log_var_c), (mu_x, log_var_x), c = gmmvae_forward(x, w_packed, b_packed)
    mu_x = jax.block_until_ready(mu_x)

    r_mu_c, r_log_var_c, r_mu_x, r_c = reference_forward(x, params)
    np.testing.assert_allclose(np.asarray(mu_c), np.asarray(r_mu_c),
                               rtol=1e-3, atol=1e-4)
    np.testing.assert_allclose(np.asarray(log_var_c), np.asarray(r_log_var_c),
                               rtol=1e-3, atol=1e-4)
    np.testing.assert_allclose(np.asarray(c), np.asarray(r_c),
                               rtol=1e-3, atol=1e-4)
    # slightly looser for mu_x: EUP approximate reciprocal in the sigmoid
    np.testing.assert_allclose(np.asarray(mu_x), np.asarray(r_mu_x),
                               rtol=5e-3, atol=1e-3)
    print("KERNEL_OK")
</pallas_src>

<mosaic_0001>
module attributes {stable_mosaic.version = 11 : i64} {
  func.func @gmmvae_fused_kernel(%arg0: i32, %arg1: memref<64x128xf32, #tpu.memory_space<vmem>>, %arg2: memref<6x128x128xbf16, #tpu.memory_space<vmem>>, %arg3: memref<8x128xf32, #tpu.memory_space<vmem>>, %arg4: memref<64x128xf32, #tpu.memory_space<vmem>>, %arg5: memref<64x16xf32, #tpu.memory_space<vmem>>) attributes {dimension_semantics = [#tpu.dimension_semantics<parallel>], iteration_bounds = array<i64: 1>, scalar_prefetch = 0 : i64, scratch_operands = 0 : i64, tpu.core_type = #tpu.core_type<tc>, window_params = [{transform_indices = @transform_0, window_bounds = array<i64: 64, 128>}, {pipeline_mode = #tpu.pipeline_mode<synchronous>, transform_indices = @transform_1, window_bounds = array<i64: 6, 128, 128>}, {pipeline_mode = #tpu.pipeline_mode<synchronous>, transform_indices = @transform_2, window_bounds = array<i64: 8, 128>}, {transform_indices = @transform_3, window_bounds = array<i64: 64, 128>}, {transform_indices = @transform_4, window_bounds = array<i64: 64, 16>}]} {
    %c0 = arith.constant 0 : index
    %c0_0 = arith.constant 0 : index
    %0 = vector.load %arg1[%c0, %c0_0] : memref<64x128xf32, #tpu.memory_space<vmem>>, vector<64x128xf32>
    %1 = arith.truncf %0 : vector<64x128xf32> to vector<64x128xbf16>
    %c0_1 = arith.constant 0 : index
    %c0_2 = arith.constant 0 : index
    %c0_3 = arith.constant 0 : index
    %2 = vector.load %arg2[%c0_1, %c0_2, %c0_3] : memref<6x128x128xbf16, #tpu.memory_space<vmem>>, vector<1x128x128xbf16>
    %3 = vector.shape_cast %2 : vector<1x128x128xbf16> to vector<128x128xbf16>
    %cst = arith.constant dense<0.000000e+00> : vector<64x128xf32>
    %4 = tpu.matmul %1, %3, %cst {dimension_numbers = #tpu.dot_dimension_numbers<[1], [0], [0], [1], [0, 0, 1, 1], [], []>} : vector<64x128xbf16>, vector<128x128xbf16>, vector<64x128xf32> -> vector<64x128xf32>
    %c0_4 = arith.constant 0 : index
    %c0_5 = arith.constant 0 : index
    %5 = vector.load %arg3[%c0_4, %c0_5] : memref<8x128xf32, #tpu.memory_space<vmem>>, vector<1x128xf32>
    %6 = vector.broadcast %5 : vector<1x128xf32> to vector<64x128xf32>
    %7 = arith.addf %4, %6 : vector<64x128xf32>
    %cst_6 = arith.constant 0.000000e+00 : f32
    %8 = vector.broadcast %cst_6 : f32 to vector<64x128xf32>
    %9 = arith.maximumf %7, %8 : vector<64x128xf32>
    %10 = arith.truncf %9 : vector<64x128xf32> to vector<64x128xbf16>
    %c1 = arith.constant 1 : index
    %c0_7 = arith.constant 0 : index
    %c0_8 = arith.constant 0 : index
    %11 = vector.load %arg2[%c1, %c0_7, %c0_8] : memref<6x128x128xbf16, #tpu.memory_space<vmem>>, vector<1x128x128xbf16>
    %12 = vector.shape_cast %11 : vector<1x128x128xbf16> to vector<128x128xbf16>
    %cst_9 = arith.constant dense<0.000000e+00> : vector<64x128xf32>
    %13 = tpu.matmul %10, %12, %cst_9 {dimension_numbers = #tpu.dot_dimension_numbers<[1], [0], [0], [1], [0, 0, 1, 1], [], []>} : vector<64x128xbf16>, vector<128x128xbf16>, vector<64x128xf32> -> vector<64x128xf32>
    %c1_10 = arith.constant 1 : index
    %c0_11 = arith.constant 0 : index
    %14 = vector.load %arg3[%c1_10, %c0_11] : memref<8x128xf32, #tpu.memory_space<vmem>>, vector<1x128xf32>
    %15 = vector.broadcast %14 : vector<1x128xf32> to vector<64x128xf32>
    %16 = arith.addf %13, %15 : vector<64x128xf32>
    %cst_12 = arith.constant 0.000000e+00 : f32
    %17 = vector.broadcast %cst_12 : f32 to vector<64x128xf32>
    %18 = arith.maximumf %16, %17 : vector<64x128xf32>
    %19 = arith.truncf %18 : vector<64x128xf32> to vector<64x128xbf16>
    %c2 = arith.constant 2 : index
    %c0_13 = arith.constant 0 : index
    %c0_14 = arith.constant 0 : index
    %20 = vector.load %arg2[%c2, %c0_13, %c0_14] : memref<6x128x128xbf16, #tpu.memory_space<vmem>>, vector<1x128x128xbf16>
    %21 = vector.shape_cast %20 : vector<1x128x128xbf16> to vector<128x128xbf16>
    %cst_15 = arith.constant dense<0.000000e+00> : vector<64x128xf32>
    %22 = tpu.matmul %19, %21, %cst_15 {dimension_numbers = #tpu.dot_dimension_numbers<[1], [0], [0], [1], [0, 0, 1, 1], [], []>} : vector<64x128xbf16>, vector<128x128xbf16>, vector<64x128xf32> -> vector<64x128xf32>
    %c2_16 = arith.constant 2 : index
    %c0_17 = arith.constant 0 : index
    %23 = vector.load %arg3[%c2_16, %c0_17] : memref<8x128xf32, #tpu.memory_space<vmem>>, vector<1x128xf32>
    %24 = vector.broadcast %23 : vector<1x128xf32> to vector<64x128xf32>
    %25 = arith.addf %22, %24 : vector<64x128xf32>
    %26 = vector.extract_strided_slice %25 {offsets = [0, 0], sizes = [64, 16], strides = [1, 1]} : vector<64x128xf32> to vector<64x16xf32>
    %c0_18 = arith.constant 0 : index
    %c0_19 = arith.constant 0 : index
    %27 = vector.load %arg5[%c0_18, %c0_19] : memref<64x16xf32, #tpu.memory_space<vmem>>, vector<64x16xf32>
    tpu.vector_store %arg5[%c0_18, %c0_19], %26 {strides = array<i32>} : memref<64x16xf32, #tpu.memory_space<vmem>>, vector<64x16xf32>,
    %28 = arith.truncf %25 : vector<64x128xf32> to vector<64x128xbf16>
    %c3 = arith.constant 3 : index
    %c0_20 = arith.constant 0 : index
    %c0_21 = arith.constant 0 : index
    %29 = vector.load %arg2[%c3, %c0_20, %c0_21] : memref<6x128x128xbf16, #tpu.memory_space<vmem>>, vector<1x128x128xbf16>
    %30 = vector.shape_cast %29 : vector<1x128x128xbf16> to vector<128x128xbf16>
    %cst_22 = arith.constant dense<0.000000e+00> : vector<64x128xf32>
    %31 = tpu.matmul %28, %30, %cst_22 {dimension_numbers = #tpu.dot_dimension_numbers<[1], [0], [0], [1], [0, 0, 1, 1], [], []>} : vector<64x128xbf16>, vector<128x128xbf16>, vector<64x128xf32> -> vector<64x128xf32>
    %c3_23 = arith.constant 3 : index
    %c0_24 = arith.constant 0 : index
    %32 = vector.load %arg3[%c3_23, %c0_24] : memref<8x128xf32, #tpu.memory_space<vmem>>, vector<1x128xf32>
    %33 = vector.broadcast %32 : vector<1x128xf32> to vector<64x128xf32>
    %34 = arith.addf %31, %33 : vector<64x128xf32>
    %cst_25 = arith.constant 0.000000e+00 : f32
    %35 = vector.broadcast %cst_25 : f32 to vector<64x128xf32>
    %36 = arith.maximumf %34, %35 : vector<64x128xf32>
    %37 = arith.truncf %36 : vector<64x128xf32> to vector<64x128xbf16>
    %c4 = arith.constant 4 : index
    %c0_26 = arith.constant 0 : index
    %c0_27 = arith.constant 0 : index
    %38 = vector.load %arg2[%c4, %c0_26, %c0_27] : memref<6x128x128xbf16, #tpu.memory_space<vmem>>, vector<1x128x128xbf16>
    %39 = vector.shape_cast %38 : vector<1x128x128xbf16> to vector<128x128xbf16>
    %cst_28 = arith.constant dense<0.000000e+00> : vector<64x128xf32>
    %40 = tpu.matmul %37, %39, %cst_28 {dimension_numbers = #tpu.dot_dimension_numbers<[1], [0], [0], [1], [0, 0, 1, 1], [], []>} : vector<64x128xbf16>, vector<128x128xbf16>, vector<64x128xf32> -> vector<64x128xf32>
    %c4_29 = arith.constant 4 : index
    %c0_30 = arith.constant 0 : index
    %41 = vector.load %arg3[%c4_29, %c0_30] : memref<8x128xf32, #tpu.memory_space<vmem>>, vector<1x128xf32>
    %42 = vector.broadcast %41 : vector<1x128xf32> to vector<64x128xf32>
    %43 = arith.addf %40, %42 : vector<64x128xf32>
    %cst_31 = arith.constant 0.000000e+00 : f32
    %44 = vector.broadcast %cst_31 : f32 to vector<64x128xf32>
    %45 = arith.maximumf %43, %44 : vector<64x128xf32>
    %46 = arith.truncf %45 : vector<64x128xf32> to vector<64x128xbf16>
    %c5 = arith.constant 5 : index
    %c0_32 = arith.constant 0 : index
    %c0_33 = arith.constant 0 : index
    %47 = vector.load %arg2[%c5, %c0_32, %c0_33] : memref<6x128x128xbf16, #tpu.memory_space<vmem>>, vector<1x128x128xbf16>
    %48 = vector.shape_cast %47 : vector<1x128x128xbf16> to vector<128x128xbf16>
    %cst_34 = arith.constant dense<0.000000e+00> : vector<64x128xf32>
    %49 = tpu.matmul %46, %48, %cst_34 {dimension_numbers = #tpu.dot_dimension_numbers<[1], [0], [0], [1], [0, 0, 1, 1], [], []>} : vector<64x128xbf16>, vector<128x128xbf16>, vector<64x128xf32> -> vector<64x128xf32>
    %c5_35 = arith.constant 5 : index
    %c0_36 = arith.constant 0 : index
    %50 = vector.load %arg3[%c5_35, %c0_36] : memref<8x128xf32, #tpu.memory_space<vmem>>, vector<1x128xf32>
    %51 = vector.broadcast %50 : vector<1x128xf32> to vector<64x128xf32>
    %52 = arith.addf %49, %51 : vector<64x128xf32>
    %cst_37 = arith.constant 0.000000e+00 : f32
    %53 = vector.broadcast %cst_37 : f32 to vector<64x128xf32>
    %54 = arith.subf %53, %52 : vector<64x128xf32>
    %55 = math.exp %54 : vector<64x128xf32>
    %cst_38 = arith.constant 1.000000e+00 : f32
    %56 = vector.broadcast %cst_38 : f32 to vector<64x128xf32>
    %57 = arith.addf %56, %55 : vector<64x128xf32>
    %58 = tpu.reciprocal %57 {approx = true} : vector<64x128xf32> -> vector<64x128xf32>
    %c0_39 = arith.constant 0 : index
    %c0_40 = arith.constant 0 : index
    %59 = vector.load %arg4[%c0_39, %c0_40] : memref<64x128xf32, #tpu.memory_space<vmem>>, vector<64x128xf32>
    tpu.vector_store %arg4[%c0_39, %c0_40], %58 {strides = array<i32>} : memref<64x128xf32, #tpu.memory_space<vmem>>, vector<64x128xf32>,
    return
  }
  func.func @transform_0(%arg0: i32) -> (i32, i32) {
    %c0_i32 = arith.constant 0 : i32
    %c0_i32_0 = arith.constant 0 : i32
    return %arg0, %c0_i32 : i32, i32
  }
  func.func @transform_1(%arg0: i32) -> (i32, i32, i32) {
    %c0_i32 = arith.constant 0 : i32
    %c0_i32_0 = arith.constant 0 : i32
    %c0_i32_1 = arith.constant 0 : i32
    %c0_i32_2 = arith.constant 0 : i32
    return %c0_i32, %c0_i32_0, %c0_i32_1 : i32, i32, i32
  }
  func.func @transform_2(%arg0: i32) -> (i32, i32) {
    %c0_i32 = arith.constant 0 : i32
    %c0_i32_0 = arith.constant 0 : i32
    %c0_i32_1 = arith.constant 0 : i32
    return %c0_i32, %c0_i32_0 : i32, i32
  }
  func.func @transform_3(%arg0: i32) -> (i32, i32) {
    %c0_i32 = arith.constant 0 : i32
    %c0_i32_0 = arith.constant 0 : i32
    return %arg0, %c0_i32 : i32, i32
  }
  func.func @transform_4(%arg0: i32) -> (i32, i32) {
    %c0_i32 = arith.constant 0 : i32
    %c0_i32_0 = arith.constant 0 : i32
    return %arg0, %c0_i32 : i32, i32
  }
}

</mosaic_0001>

<bundles_post_ra>
// kernel: gmmvae_forward.1
= control target key start
LH: loop header
LB: loop body
LE: loop exit
PB: predicated region body
PF: predicated region fallthrough
CT: control target
= control target key end

     0   :  { %10 = vsyncpa [#allocation3], 0  ;;  %s1580_s0 = inlined_call_operand.hbm [shape: f32[64,128], index: 0, kind: input, shape index: {}]   ;;  %s1581_s1 = inlined_call_operand.hbm [shape: bf16[6,128,128], index: 1, kind: input, shape index: {}]   ;;  %s1582_s2 = inlined_call_operand.hbm [shape: f32[8,128], index: 2, kind: input, shape index: {}]   ;;  %s1583_s3 = inlined_call_operand.hbm [shape: f32[64,128], index: 3, kind: output, shape index: {0}]   ;;  %s1584_s4 = inlined_call_operand.vmem [shape: f32[64,16], index: 4, kind: output, shape index: {1}]  }
   0x1   :  { %11 = vsyncpa [#allocation6], 0 }
   0x2   :  { %12 = vsyncpa [#allocation4], 0  ;;  %s1461_s15 = smov [#allocation5]   ;;  %s1367_s19 = scalar_lea.hbm %s1581_s1, 6144 }
   0x3   :  { %s30_s16 = sshll.u32 %s1461_s15, 4  ;;  %p1368_p0 = scmp.ne.s32.totalorder %s1581_s1, %s1367_s19  ;;  %s31_s16 = int_to_ptr.vmem [resolvable:$true] %s30_s16 }
   0x4   :  { %p1371_p1 = scmp.lt.u32.totalorder %s1367_s19, %s1581_s1 }
   0x6   :  { %p1373_p2 = pnand %p1371_p1, %p1368_p0 }
   0x8   :  { %1376 = shalt.err (!%p1373_p2)
}
   0x9   :  { %s1377_s24 = scalar_lea.vmem %s31_s16, 6144  ;;  %p1382_p4 = scmp.lt.s32.totalorder %s31_s16, %s31_s16 }
   0xa   :  { %p1378_p3 = scmp.ne.s32.totalorder %s31_s16, %s1377_s24  ;;  %p1383_p5 = scmp.lt.s32.totalorder %s1377_s24, %s1377_s24 }
   0xc   :  { %p1384_p6 = por %p1383_p5, %p1382_p4 }
   0xe   :  { %p1385_p7 = pnand %p1384_p6, %p1378_p3 }
  0x10   :  { %1388 = shalt.err (!%p1385_p7)
}
  0x11   :  { %s1462_s25 = smov 64   ;;  %s1463_s26 = smov 4  }
  0x12   :  { %36 = dma.hbm_to_vmem [thread:$0]  %s1581_s1, 6144, %s31_s16, [#allocation6], %s1462_s25, %s1462_s25, %s1463_s26  }
  0x13   :  { %s1464_s29 = smov [#allocation2]   ;;  %s1389_s7 = scalar_lea.hbm %s1580_s0, 1024 }
  0x14   :  { %s18_s30 = sshll.u32 %s1464_s29, 4  ;;  %p1390_p8 = scmp.ne.s32.totalorder %s1580_s0, %s1389_s7  ;;  %s19_s30 = int_to_ptr.vmem [resolvable:$true] %s18_s30 }
  0x15   :  { %p1393_p9 = scmp.lt.u32.totalorder %s1389_s7, %s1580_s0 }
  0x17   :  { %p1395_p10 = pnand %p1393_p9, %p1390_p8 }
  0x19   :  { %1398 = shalt.err (!%p1395_p10)
}
  0x1a   :  { %s1399_s12 = scalar_lea.vmem %s19_s30, 1024  ;;  %p1404_p12 = scmp.lt.s32.totalorder %s19_s30, %s19_s30 }
  0x1b   :  { %p1400_p11 = scmp.ne.s32.totalorder %s19_s30, %s1399_s12  ;;  %p1405_p13 = scmp.lt.s32.totalorder %s1399_s12, %s1399_s12 }
  0x1d   :  { %p1406_p0 = por %p1405_p13, %p1404_p12 }
  0x1f   :  { %p1407_p1 = pnand %p1406_p0, %p1400_p11 }
  0x21   :  { %1410 = shalt.err (!%p1407_p1)
}
  0x22   :  { %s1465_s1 = smov 128   ;;  %s1466_s13 = smov 8  }
  0x23   :  { %24 = dma.hbm_to_vmem [thread:$0]  %s1580_s0, 1024, %s19_s30, [#allocation3], %s1465_s1, %s1465_s1, %s1466_s13  }
  0x24   :  { %s1467_s16 = smov [#allocation7]   ;;  %s1411_s20 = scalar_lea.hbm %s1582_s2, 128 }
  0x25   :  { %s43_s17 = sshll.u32 %s1467_s16, 4  ;;  %p1412_p2 = scmp.ne.s32.totalorder %s1582_s2, %s1411_s20  ;;  %s44_s17 = int_to_ptr.vmem [resolvable:$true] %s43_s17 }
  0x26   :  { %p1415_p3 = scmp.lt.u32.totalorder %s1411_s20, %s1582_s2 }
  0x28   :  { %p1417_p4 = pnand %p1415_p3, %p1412_p2 }
  0x2a   :  { %1420 = shalt.err (!%p1417_p4)
}
  0x2b   :  { %s1421_s25 = scalar_lea.vmem %s44_s17, 128  ;;  %p1426_p6 = scmp.lt.s32.totalorder %s44_s17, %s44_s17 }
  0x2c   :  { %p1422_p5 = scmp.ne.s32.totalorder %s44_s17, %s1421_s25  ;;  %p1427_p7 = scmp.lt.s32.totalorder %s1421_s25, %s1421_s25 }
  0x2e   :  { %p1428_p8 = por %p1427_p7, %p1426_p6 }
  0x30   :  { %p1429_p9 = pnand %p1428_p8, %p1422_p5 }
  0x32   :  { %1432 = shalt.err (!%p1429_p9)
}
  0x33   :  { %46 = dma.hbm_to_vmem [thread:$0]  %s1582_s2, 128, %s44_s17, [#allocation6]  }
  0x34   :  { %1455 = dma.done.wait [#allocation3], 1024  }
  0x35   :  { %1456 = vsyncadd [#allocation3], 4294966272 }
  0x36   :  { %1457 = dma.done.wait [#allocation6], 6272  }
  0x37   :  { %1458 = vsyncadd [#allocation6], 4294961024  ;;  %v1287_v0 = vld [vmem:[#allocation5] sm:$0xff]   ;;  %v1288_v1 = vld [vmem:[#allocation5 + $0x8] sm:$0xff]   ;;  %vm497_vm0 = vcmask 130048  }
  0x38   :  { %1135 = vmatprep.subr.bf16.mxu0 %v1287_v0  ;;  %v1289_v2 = vld [vmem:[#allocation5 + $0x10] sm:$0xff]   ;;  %v1290_v3 = vld [vmem:[#allocation5 + $0x18] sm:$0xff]   ;;  %v57_v4 = vld [vmem:[#allocation2] sm:$0xff] }
  0x39   :  { %1136 = vmatpush3.bf16.msra.mxu0 %v1287_v0  ;;  %v58_v5 = vld [vmem:[#allocation2 + $0x8] sm:$0xff]  ;;  %v1291_v7 = vld [vmem:[#allocation5 + $0x20] sm:$0xff]   ;;  %v1297_v10 = vld [vmem:[#allocation5 + $0x50] sm:$0xff]  }
  0x3a   :  { %1137 = vmatprep.subr.bf16.mxu0 %v1288_v1  ;;  %v65_v6 = vpack.c.bf16 %v58_v5, %v57_v4  ;;  %v1295_v8 = vld [vmem:[#allocation5 + $0x40] sm:$0xff]   ;;  %v1296_v9 = vld [vmem:[#allocation5 + $0x48] sm:$0xff]   ;;  %v1298_v12 = vld [vmem:[#allocation5 + $0x58] sm:$0xff]  }
  0x3b   :  { %1159 = vmatprep.subr.bf16.mxu1 %v1295_v8  ;;  %v1292_v11 = vld [vmem:[#allocation5 + $0x28] sm:$0xff]   ;;  %v1293_v13 = vld [vmem:[#allocation5 + $0x30] sm:$0xff]   ;;  %v1299_v14 = vld [vmem:[#allocation5 + $0x60] sm:$0xff]  }
  0x3c   :  { %1151 = vmatprep.mubr.bf16.mxu0 %v65_v6  ;;  %1160 = vmatpush3.bf16.msra.mxu1 %v1295_v8  ;;  %v1294_v15 = vld [vmem:[#allocation5 + $0x38] sm:$0xff]   ;;  %v59_v16 = vld [vmem:[#allocation2 + $0x10] sm:$0xff]  ;;  %v1300_v18 = vld [vmem:[#allocation5 + $0x68] sm:$0xff]  }
  0x3d   :  { %1138 = vmatpush3.bf16.msra.mxu0 %v1288_v1  ;;  %1161 = vmatprep.subr.bf16.mxu1 %v1296_v9  ;;  %v60_v17 = vld [vmem:[#allocation2 + $0x18] sm:$0xff]  ;;  %v61_v19 = vld [vmem:[#allocation2 + $0x20] sm:$0xff]  ;;  %v62_v20 = vld [vmem:[#allocation2 + $0x28] sm:$0xff] }
  0x3e   :  { %1139 = vmatprep.subr.bf16.mxu0 %v1289_v2  ;;  %v66_v21 = vpack.c.bf16 %v60_v17, %v59_v16  ;;  %v67_v22 = vpack.c.bf16 %v62_v20, %v61_v19  ;;  %v63_v23 = vld [vmem:[#allocation2 + $0x30] sm:$0xff]  ;;  %v64_v24 = vld [vmem:[#allocation2 + $0x38] sm:$0xff]  ;;  %v1303_v28 = vld [vmem:[#allocation5 + $0x80] sm:$0xff]  }
  0x3f   :  { %v68_v25 = vpack.c.bf16 %v64_v24, %v63_v23  ;;  %v1301_v26 = vld [vmem:[#allocation5 + $0x70] sm:$0xff]   ;;  %v1302_v27 = vld [vmem:[#allocation5 + $0x78] sm:$0xff]   ;;  %v1304_v29 = vld [vmem:[#allocation5 + $0x88] sm:$0xff]  }
  0x40   :  { %1162 = vmatpush3.bf16.msra.mxu1 %v1296_v9  ;;  %v1305_v30 = vld [vmem:[#allocation5 + $0x90] sm:$0xff]   ;;  %v1306_v31 = vld [vmem:[#allocation5 + $0x98] sm:$0xff]   ;;  %v1307_v32 = vld [vmem:[#allocation5 + $0xa0] sm:$0xff]  }
  0x41   :  { %1140 = vmatpush3.bf16.msra.mxu0 %v1289_v2  ;;  %1163 = vmatprep.subr.bf16.mxu1 %v1297_v10  ;;  %v1308_v33 = vld [vmem:[#allocation5 + $0xa8] sm:$0xff]   ;;  %v1009_v34 = vld [vmem:[#allocation7] ss:$0 sm:$0xff]  ;;  %v1309_v63 = vld [vmem:[#allocation5 + $0xb0] sm:$0xff]  }
  0x42   :  { %1141 = vmatprep.subr.bf16.mxu0 %v1290_v3  ;;  %v1310_v0 = vld [vmem:[#allocation5 + $0xb8] sm:$0xff]   ;;  %v1311_v1 = vld [vmem:[#allocation5 + $0xc0] sm:$0xff]   ;;  %v1312_v2 = vld [vmem:[#allocation5 + $0xc8] sm:$0xff]  }
  0x43   :  { %v1314_v4 = vld [vmem:[#allocation5 + $0xd8] sm:$0xff]   ;;  %v1315_v5 = vld [vmem:[#allocation5 + $0xe0] sm:$0xff]   ;;  %v1316_v6 = vld [vmem:[#allocation5 + $0xe8] sm:$0xff]  }
  0x44   :  { %1164 = vmatpush3.bf16.msra.mxu1 %v1297_v10 }
  0x45   :  { %1142 = vmatpush3.bf16.msra.mxu0 %v1290_v3  ;;  %1165 = vmatprep.subr.bf16.mxu1 %v1298_v12  ;;  %v1313_v3 = vld [vmem:[#allocation5 + $0xd0] sm:$0xff]  }
  0x46   :  { %1143 = vmatprep.subr.bf16.mxu0 %v1291_v7 }
  0x48   :  { %1166 = vmatpush3.bf16.msra.mxu1 %v1298_v12 }
  0x49   :  { %1144 = vmatpush3.bf16.msra.mxu0 %v1291_v7  ;;  %1167 = vmatprep.subr.bf16.mxu1 %v1299_v14  ;;  %v1018_v7 = vld [vmem:[#allocation7 + $0x1] ss:$0 sm:$0xff] }
  0x4a   :  { %1145 = vmatprep.subr.bf16.mxu0 %v1292_v11 }
  0x4c   :  { %1168 = vmatpush3.bf16.msra.mxu1 %v1299_v14 }
  0x4d   :  { %1146 = vmatpush3.bf16.msra.mxu0 %v1292_v11  ;;  %1169 = vmatprep.subr.bf16.mxu1 %v1300_v18 }
  0x4e   :  { %1147 = vmatprep.subr.bf16.mxu0 %v1293_v13 }
  0x50   :  { %1170 = vmatpush3.bf16.msra.mxu1 %v1300_v18 }
  0x51   :  { %1148 = vmatpush3.bf16.msra.mxu0 %v1293_v13  ;;  %1171 = vmatprep.subr.bf16.mxu1 %v1301_v26 }
  0x52   :  { %1149 = vmatprep.subr.bf16.mxu0 %v1294_v15 }
  0x54   :  { %1172 = vmatpush3.bf16.msra.mxu1 %v1301_v26 }
  0x55   :  { %1150 = vmatpush3.bf16.msra.mxu0 %v1294_v15  ;;  %1173 = vmatprep.subr.bf16.mxu1 %v1302_v27 }
  0x56   :  { %1183 = vmatprep.subr.bf16.mxu0 %v1303_v28 }
  0x58   :  { %1152 = vmatmul.mubr.bf16.vlgmr.msra.gmra.mrb[0].mxu0 %v66_v21  ;;  %1174 = vmatpush3.bf16.msra.mxu1 %v1302_v27 }
  0x59   :  { %1155 = vmatprep.mubr.bf16.mxu0 %v67_v22  ;;  %1184 = vmatpush3.bf16.msra.mxu0 %v1303_v28 }
  0x5a   :  { %1185 = vmatprep.subr.bf16.mxu0 %v1304_v29  ;;  %1207 = vmatprep.subr.bf16.mxu1 %v1311_v1 }
  0x5d   :  { %1186 = vmatpush3.bf16.msra.mxu0 %v1304_v29 }
  0x5e   :  { %1187 = vmatprep.subr.bf16.mxu0 %v1305_v30 }
  0x60   :  { %1156 = vmatmul.mubr.bf16.gmra.mrb[4].mxu0 %v68_v25 }
  0x61   :  { %1188 = vmatpush3.bf16.msra.mxu0 %v1305_v30 }
  0x62   :  { %1189 = vmatprep.subr.bf16.mxu0 %v1306_v31 }
  0x65   :  { %1190 = vmatpush3.bf16.msra.mxu0 %v1306_v31 }
  0x66   :  { %1191 = vmatprep.subr.bf16.mxu0 %v1307_v32 }
  0x69   :  { %1192 = vmatpush3.bf16.msra.mxu0 %v1307_v32 }
  0x6a   :  { %1193 = vmatprep.subr.bf16.mxu0 %v1308_v33 }
  0x6d   :  { %1194 = vmatpush3.bf16.msra.mxu0 %v1308_v33 }
  0x6e   :  { %1195 = vmatprep.subr.bf16.mxu0 %v1309_v63 }
  0x71   :  { %1196 = vmatpush3.bf16.msra.mxu0 %v1309_v63 }
  0x72   :  { %1197 = vmatprep.subr.bf16.mxu0 %v1310_v0 }
  0x75   :  { %1198 = vmatpush3.bf16.msra.mxu0 %v1310_v0 }
 0x12b   :  { %v1153_v35 = vpop.f32.mrb[0].mxu0 }
 0x12c   :  { %v181_v36 = vadd.f32 %v1153_v35, %v1009_v34  ;;  %v172_v37 = vpop.f32.mrb[1].mxu0 }
 0x12d   :  { %v173_v38 = vadd.f32 %v1009_v34, %v172_v37  ;;  %v1154_v39 = vpop.f32.mrb[2].mxu0  ;;  %v1318_v37 = vld [vmem:[#allocation5 + $0xf8] sm:$0xff]  }
 0x12e   :  { %v184_v40 = vadd.f32 %v1154_v39, %v1009_v34  ;;  %v175_v41 = vpop.f32.mrb[3].mxu0  ;;  %v205_v43 = vmax.f32 %v181_v36, 0.0  ;;  %v1317_v36 = vld [vmem:[#allocation5 + $0xf0] sm:$0xff]   ;;  %v1320_v39 = vld [vmem:[#allocation5 + $0x108] sm:$0xff]  }
 0x12f   :  { %v176_v42 = vadd.f32 %v1009_v34, %v175_v41  ;;  %v203_v45 = vmax.f32 %v173_v38, 0.0  ;;  %v1319_v38 = vld [vmem:[#allocation5 + $0x100] sm:$0xff]   ;;  %v1322_v41 = vld [vmem:[#allocation5 + $0x118] sm:$0xff]  }
 0x130   :  { %v206_v44 = vmax.f32 %v184_v40, 0.0  ;;  %1231 = vmatprep.subr.bf16.mxu0 %v1319_v38  ;;  %v1321_v40 = vld [vmem:[#allocation5 + $0x110] sm:$0xff]  }
 0x131   :  { %v204_v46 = vmax.f32 %v176_v42, 0.0  ;;  %v1323_v42 = vld [vmem:[#allocation5 + $0x120] sm:$0xff]  }
 0x132   :  { %v212_v47 = vpack.c.bf16 %v206_v44, %v205_v43  ;;  %v1324_v43 = vld [vmem:[#allocation5 + $0x128] sm:$0xff]   ;;  %v1027_v44 = vld [vmem:[#allocation7 + $0x2] ss:$0 sm:$0xff] }
 0x133   :  { %v1157_v48 = vpop.f32.mrb[4].mxu0  ;;  %v211_v49 = vpack.c.bf16 %v204_v46, %v203_v45 }
 0x134   :  { %v197_v50 = vadd.f32 %v1157_v48, %v1009_v34  ;;  %v188_v51 = vpop.f32.mrb[5].mxu0 }
 0x135   :  { %v189_v52 = vadd.f32 %v1009_v34, %v188_v51  ;;  %v1158_v53 = vpop.f32.mrb[6].mxu0  ;;  %1175 = vmatprep.mubr.bf16.mxu1 %v211_v49 }
 0x136   :  { %v200_v54 = vadd.f32 %v1158_v53, %v1009_v34  ;;  %v191_v55 = vpop.f32.mrb[7].mxu0  ;;  %1176 = vmatmul.mubr.bf16.vlgmr.msra.gmra.mrb[0].mxu1 %v212_v47  ;;  %v209_v57 = vmax.f32 %v197_v50, 0.0 }
 0x137   :  { %v192_v56 = vadd.f32 %v1009_v34, %v191_v55  ;;  %v207_v59 = vmax.f32 %v189_v52, 0.0  ;;  %1208 = vmatpush3.bf16.msra.mxu1 %v1311_v1  ;;  %v1325_v1 = vld [vmem:[#allocation5 + $0x130] sm:$0xff]  }
 0x138   :  { %v210_v58 = vmax.f32 %v200_v54, 0.0  ;;  %1209 = vmatprep.subr.bf16.mxu1 %v1312_v2 }
 0x139   :  { %v208_v60 = vmax.f32 %v192_v56, 0.0 }
 0x13a   :  { %v214_v61 = vpack.c.bf16 %v210_v58, %v209_v57 }
 0x13b   :  { %v213_v62 = vpack.c.bf16 %v208_v60, %v207_v59  ;;  %1210 = vmatpush3.bf16.msra.mxu1 %v1312_v2  ;;  %v1326_v2 = vld [vmem:[#allocation5 + $0x138] sm:$0xff]  }
 0x13c   :  { %1211 = vmatprep.subr.bf16.mxu1 %v1313_v3 }
 0x13d   :  { %1179 = vmatprep.mubr.bf16.mxu1 %v213_v62 }
 0x13e   :  { %1180 = vmatmul.mubr.bf16.gmra.mrb[4].mxu1 %v214_v61 }
 0x13f   :  { %1212 = vmatpush3.bf16.msra.mxu1 %v1313_v3  ;;  %v1327_v3 = vld [vmem:[#allocation5 + $0x140] sm:$0xff]  }
 0x140   :  { %1213 = vmatprep.subr.bf16.mxu1 %v1314_v4 }
 0x143   :  { %1214 = vmatpush3.bf16.msra.mxu1 %v1314_v4  ;;  %v1328_v4 = vld [vmem:[#allocation5 + $0x148] sm:$0xff]  }
 0x144   :  { %1215 = vmatprep.subr.bf16.mxu1 %v1315_v5 }
 0x147   :  { %1216 = vmatpush3.bf16.msra.mxu1 %v1315_v5  ;;  %v1329_v5 = vld [vmem:[#allocation5 + $0x150] sm:$0xff]  }
 0x148   :  { %1217 = vmatprep.subr.bf16.mxu1 %v1316_v6 }
 0x14b   :  { %1218 = vmatpush3.bf16.msra.mxu1 %v1316_v6  ;;  %v1330_v6 = vld [vmem:[#allocation5 + $0x158] sm:$0xff]  }
 0x14c   :  { %1219 = vmatprep.subr.bf16.mxu1 %v1317_v36 }
 0x14f   :  { %1220 = vmatpush3.bf16.msra.mxu1 %v1317_v36 }
 0x150   :  { %1221 = vmatprep.subr.bf16.mxu1 %v1318_v37 }
 0x153   :  { %1222 = vmatpush3.bf16.msra.mxu1 %v1318_v37 }
 0x154   :  { %1255 = vmatprep.subr.bf16.mxu1 %v1327_v3 }
 0x209   :  { %v1177_v8 = vpop.f32.mrb[0].mxu1 }
 0x20a   :  { %v328_v9 = vadd.f32 %v1177_v8, %v1018_v7  ;;  %v319_v10 = vpop.f32.mrb[1].mxu1  ;;  %v1332_v8 = vld [vmem:[#allocation5 + $0x168] sm:$0xff]  }
 0x20b   :  { %v320_v11 = vadd.f32 %v1018_v7, %v319_v10  ;;  %v1178_v12 = vpop.f32.mrb[2].mxu1 }
 0x20c   :  { %v331_v13 = vadd.f32 %v1178_v12, %v1018_v7  ;;  %v322_v14 = vpop.f32.mrb[3].mxu1  ;;  %v352_v16 = vmax.f32 %v328_v9, 0.0  ;;  %v1036_v9 = vld [vmem:[#allocation7 + $0x3] ss:$0 sm:$0xff] }
 0x20d   :  { %v323_v15 = vadd.f32 %v1018_v7, %v322_v14  ;;  %v350_v18 = vmax.f32 %v320_v11, 0.0 }
 0x20e   :  { %v353_v17 = vmax.f32 %v331_v13, 0.0 }
 0x20f   :  { %v351_v19 = vmax.f32 %v323_v15, 0.0 }
 0x210   :  { %v359_v20 = vpack.c.bf16 %v353_v17, %v352_v16 }
 0x211   :  { %v358_v21 = vpack.c.bf16 %v351_v19, %v350_v18  ;;  %v1181_v22 = vpop.f32.mrb[4].mxu1 }
 0x212   :  { %v344_v23 = vadd.f32 %v1181_v22, %v1018_v7  ;;  %v335_v24 = vpop.f32.mrb[5].mxu1 }
 0x213   :  { %v336_v25 = vadd.f32 %v1018_v7, %v335_v24  ;;  %v1182_v26 = vpop.f32.mrb[6].mxu1  ;;  %1199 = vmatprep.mubr.bf16.mxu0 %v358_v21 }
 0x214   :  { %v347_v27 = vadd.f32 %v1182_v26, %v1018_v7  ;;  %v338_v28 = vpop.f32.mrb[7].mxu1  ;;  %1200 = vmatmul.mubr.bf16.vlgmr.msra.gmra.mrb[8].mxu0 %v359_v20  ;;  %v356_v30 = vmax.f32 %v344_v23, 0.0 }
 0x215   :  { %v339_v29 = vadd.f32 %v1018_v7, %v338_v28  ;;  %v354_v32 = vmax.f32 %v336_v25, 0.0  ;;  %1232 = vmatpush3.bf16.msra.mxu0 %v1319_v38  ;;  %v1331_v7 = vld [vmem:[#allocation5 + $0x160] sm:$0xff]   ;;  %v1333_v38 = vld [vmem:[#allocation5 + $0x170] sm:$0xff]  }
 0x216   :  { %v357_v31 = vmax.f32 %v347_v27, 0.0  ;;  %1233 = vmatprep.subr.bf16.mxu0 %v1320_v39 }
 0x217   :  { %v355_v33 = vmax.f32 %v339_v29, 0.0 }
 0x218   :  { %v361_v34 = vpack.c.bf16 %v357_v31, %v356_v30 }
 0x219   :  { %v360_v35 = vpack.c.bf16 %v355_v33, %v354_v32  ;;  %1234 = vmatpush3.bf16.msra.mxu0 %v1320_v39  ;;  %v1334_v39 = vld [vmem:[#allocation5 + $0x178] sm:$0xff]  }
 0x21a   :  { %1235 = vmatprep.subr.bf16.mxu0 %v1321_v40 }
 0x21b   :  { %1203 = vmatprep.mubr.bf16.mxu0 %v360_v35 }
 0x21c   :  { %1204 = vmatmul.mubr.bf16.gmra.mrb[12].mxu0 %v361_v34 }
 0x21d   :  { %1236 = vmatpush3.bf16.msra.mxu0 %v1321_v40  ;;  %v1045_v40 = vld [vmem:[#allocation7 + $0x4] ss:$0 sm:$0xff] }
 0x21e   :  { %1237 = vmatprep.subr.bf16.mxu0 %v1322_v41 }
 0x221   :  { %1238 = vmatpush3.bf16.msra.mxu0 %v1322_v41 }
 0x222   :  { %1239 = vmatprep.subr.bf16.mxu0 %v1323_v42 }
 0x225   :  { %1240 = vmatpush3.bf16.msra.mxu0 %v1323_v42 }
 0x226   :  { %1241 = vmatprep.subr.bf16.mxu0 %v1324_v43 }
 0x229   :  { %1242 = vmatpush3.bf16.msra.mxu0 %v1324_v43 }
 0x22a   :  { %1243 = vmatprep.subr.bf16.mxu0 %v1325_v1 }
 0x22d   :  { %1244 = vmatpush3.bf16.msra.mxu0 %v1325_v1 }
 0x22e   :  { %1245 = vmatprep.subr.bf16.mxu0 %v1326_v2 }
 0x231   :  { %1246 = vmatpush3.bf16.msra.mxu0 %v1326_v2 }
 0x2e7   :  { %v1201_v45 = vpop.f32.mrb[8].mxu0 }
 0x2e8   :  { %v475_v46 = vadd.f32 %v1201_v45, %v1027_v44  ;;  %v466_v47 = vpop.f32.mrb[9].mxu0 }
 0x2e9   :  { %v467_v48 = vadd.f32 %v1027_v44, %v466_v47  ;;  %v1202_v49 = vpop.f32.mrb[10].mxu0 }
 0x2ea   :  { %500 = vst.msk [vmem:[%s1584_s4 + $0x10] sm:$0xff] %vm497_vm0, %v475_v46  ;;  %v478_v50 = vadd.f32 %v1202_v49, %v1027_v44  ;;  %v469_v51 = vpop.f32.mrb[11].mxu0 }
 0x2eb   :  { %498 = vst.msk [vmem:[%s1584_s4] sm:$0xff] %vm497_vm0, %v467_v48  ;;  %v470_v52 = vadd.f32 %v1027_v44, %v469_v51 }
 0x2ec   :  { %501 = vst.msk [vmem:[%s1584_s4 + $0x18] sm:$0xff] %vm497_vm0, %v478_v50  ;;  %v507_v53 = vpack.c.bf16 %v478_v50, %v475_v46 }
 0x2ed   :  { %499 = vst.msk [vmem:[%s1584_s4 + $0x8] sm:$0xff] %vm497_vm0, %v470_v52  ;;  %v506_v54 = vpack.c.bf16 %v470_v52, %v467_v48 }
 0x2ef   :  { %v1205_v55 = vpop.f32.mrb[12].mxu0  ;;  %1223 = vmatprep.mubr.bf16.mxu1 %v506_v54 }
 0x2f0   :  { %v491_v56 = vadd.f32 %v1205_v55, %v1027_v44  ;;  %v482_v57 = vpop.f32.mrb[13].mxu0  ;;  %1224 = vmatmul.mubr.bf16.vlgmr.msra.gmra.mrb[8].mxu1 %v507_v53 }
 0x2f1   :  { %v483_v58 = vadd.f32 %v1027_v44, %v482_v57  ;;  %v1206_v59 = vpop.f32.mrb[14].mxu0  ;;  %1256 = vmatpush3.bf16.msra.mxu1 %v1327_v3 }
 0x2f2   :  { %504 = vst.msk [vmem:[%s1584_s4 + $0x30] sm:$0xff] %vm497_vm0, %v491_v56  ;;  %v494_v60 = vadd.f32 %v1206_v59, %v1027_v44  ;;  %v485_v61 = vpop.f32.mrb[15].mxu0  ;;  %1257 = vmatprep.subr.bf16.mxu1 %v1328_v4 }
 0x2f3   :  { %502 = vst.msk [vmem:[%s1584_s4 + $0x20] sm:$0xff] %vm497_vm0, %v483_v58  ;;  %v486_v62 = vadd.f32 %v1027_v44, %v485_v61 }
 0x2f4   :  { %505 = vst.msk [vmem:[%s1584_s4 + $0x38] sm:$0xff] %vm497_vm0, %v494_v60  ;;  %v509_v63 = vpack.c.bf16 %v494_v60, %v491_v56 }
 0x2f5   :  { %503 = vst.msk [vmem:[%s1584_s4 + $0x28] sm:$0xff] %vm497_vm0, %v486_v62  ;;  %v508_v0 = vpack.c.bf16 %v486_v62, %v483_v58  ;;  %1258 = vmatpush3.bf16.msra.mxu1 %v1328_v4  ;;  %s1468_s4 = smov [#allocation8]  }
 0x2f6   :  { %1259 = vmatprep.subr.bf16.mxu1 %v1329_v5  ;;  %s992_s17 = sshll.u32 %s1468_s4, 4  ;;  %s993_s17 = int_to_ptr.vmem [resolvable:$true] %s992_s17 }
 0x2f7   :  { %1227 = vmatprep.mubr.bf16.mxu1 %v508_v0  ;;  %s1433_s18 = scalar_lea.vmem %s993_s17, 1024  ;;  %p1438_p11 = scmp.lt.s32.totalorder %s993_s17, %s993_s17 }
 0x2f8   :  { %1228 = vmatmul.mubr.bf16.gmra.mrb[12].mxu1 %v509_v63  ;;  %p1434_p10 = scmp.ne.s32.totalorder %s993_s17, %s1433_s18  ;;  %p1439_p12 = scmp.lt.s32.totalorder %s1433_s18, %s1433_s18 }
 0x2f9   :  { %1260 = vmatpush3.bf16.msra.mxu1 %v1329_v5  ;;  %v1054_v5 = vld [vmem:[#allocation7 + $0x5] ss:$0 sm:$0xff] }
 0x2fa   :  { %1261 = vmatprep.subr.bf16.mxu1 %v1330_v6  ;;  %p1440_p13 = por %p1439_p12, %p1438_p11 }
 0x2fc   :  { %p1441_p0 = pnand %p1440_p13, %p1434_p10 }
 0x2fd   :  { %1262 = vmatpush3.bf16.msra.mxu1 %v1330_v6 }
 0x2fe   :  { %1263 = vmatprep.subr.bf16.mxu1 %v1331_v7 }
 0x301   :  { %1264 = vmatpush3.bf16.msra.mxu1 %v1331_v7 }
 0x302   :  { %1265 = vmatprep.subr.bf16.mxu1 %v1332_v8 }
 0x305   :  { %1266 = vmatpush3.bf16.msra.mxu1 %v1332_v8 }
 0x306   :  { %1267 = vmatprep.subr.bf16.mxu1 %v1333_v38 }
 0x309   :  { %1268 = vmatpush3.bf16.msra.mxu1 %v1333_v38 }
 0x30a   :  { %1269 = vmatprep.subr.bf16.mxu1 %v1334_v39 }
 0x30d   :  { %1270 = vmatpush3.bf16.msra.mxu1 %v1334_v39 }
 0x3c3   :  { %v1225_v10 = vpop.f32.mrb[8].mxu1 }
 0x3c4   :  { %v623_v11 = vadd.f32 %v1225_v10, %v1036_v9  ;;  %v614_v12 = vpop.f32.mrb[9].mxu1 }
 0x3c5   :  { %v615_v13 = vadd.f32 %v1036_v9, %v614_v12  ;;  %v1226_v14 = vpop.f32.mrb[10].mxu1 }
 0x3c6   :  { %v626_v15 = vadd.f32 %v1226_v14, %v1036_v9  ;;  %v617_v16 = vpop.f32.mrb[11].mxu1  ;;  %v647_v18 = vmax.f32 %v623_v11, 0.0 }
 0x3c7   :  { %v618_v17 = vadd.f32 %v1036_v9, %v617_v16  ;;  %v645_v20 = vmax.f32 %v615_v13, 0.0 }
 0x3c8   :  { %v648_v19 = vmax.f32 %v626_v15, 0.0 }
 0x3c9   :  { %v646_v21 = vmax.f32 %v618_v17, 0.0 }
 0x3ca   :  { %v654_v22 = vpack.c.bf16 %v648_v19, %v647_v18 }
 0x3cb   :  { %v653_v23 = vpack.c.bf16 %v646_v21, %v645_v20  ;;  %v1229_v24 = vpop.f32.mrb[12].mxu1 }
 0x3cc   :  { %v639_v25 = vadd.f32 %v1229_v24, %v1036_v9  ;;  %v630_v26 = vpop.f32.mrb[13].mxu1 }
 0x3cd   :  { %v631_v27 = vadd.f32 %v1036_v9, %v630_v26  ;;  %v1230_v28 = vpop.f32.mrb[14].mxu1  ;;  %1247 = vmatprep.mubr.bf16.mxu0 %v653_v23 }
 0x3ce   :  { %v642_v29 = vadd.f32 %v1230_v28, %v1036_v9  ;;  %v633_v30 = vpop.f32.mrb[15].mxu1  ;;  %1248 = vmatmul.mubr.bf16.vlgmr.msra.gmra.mrb[16].mxu0 %v654_v22  ;;  %v651_v32 = vmax.f32 %v639_v25, 0.0 }
 0x3cf   :  { %v634_v31 = vadd.f32 %v1036_v9, %v633_v30  ;;  %v649_v34 = vmax.f32 %v631_v27, 0.0 }
 0x3d0   :  { %v652_v33 = vmax.f32 %v642_v29, 0.0 }
 0x3d1   :  { %v650_v35 = vmax.f32 %v634_v31, 0.0 }
 0x3d2   :  { %v656_v36 = vpack.c.bf16 %v652_v33, %v651_v32 }
 0x3d3   :  { %v655_v37 = vpack.c.bf16 %v650_v35, %v649_v34 }
 0x3d5   :  { %1251 = vmatprep.mubr.bf16.mxu0 %v655_v37 }
 0x3d6   :  { %1252 = vmatmul.mubr.bf16.gmra.mrb[20].mxu0 %v656_v36 }
 0x4a1   :  { %v1249_v41 = vpop.f32.mrb[16].mxu0 }
 0x4a2   :  { %v770_v42 = vadd.f32 %v1249_v41, %v1045_v40  ;;  %v761_v43 = vpop.f32.mrb[17].mxu0 }
 0x4a3   :  { %v762_v44 = vadd.f32 %v1045_v40, %v761_v43  ;;  %v1250_v45 = vpop.f32.mrb[18].mxu0 }
 0x4a4   :  { %v773_v46 = vadd.f32 %v1250_v45, %v1045_v40  ;;  %v764_v47 = vpop.f32.mrb[19].mxu0  ;;  %v794_v49 = vmax.f32 %v770_v42, 0.0 }
 0x4a5   :  { %v765_v48 = vadd.f32 %v1045_v40, %v764_v47  ;;  %v792_v51 = vmax.f32 %v762_v44, 0.0 }
 0x4a6   :  { %v795_v50 = vmax.f32 %v773_v46, 0.0 }
 0x4a7   :  { %v793_v52 = vmax.f32 %v765_v48, 0.0 }
 0x4a8   :  { %v801_v53 = vpack.c.bf16 %v795_v50, %v794_v49 }
 0x4a9   :  { %v800_v54 = vpack.c.bf16 %v793_v52, %v792_v51  ;;  %v1253_v55 = vpop.f32.mrb[20].mxu0 }
 0x4aa   :  { %v786_v56 = vadd.f32 %v1253_v55, %v1045_v40  ;;  %v777_v57 = vpop.f32.mrb[21].mxu0 }
 0x4ab   :  { %v778_v58 = vadd.f32 %v1045_v40, %v777_v57  ;;  %v1254_v59 = vpop.f32.mrb[22].mxu0  ;;  %1271 = vmatprep.mubr.bf16.mxu1 %v800_v54 }
 0x4ac   :  { %v789_v60 = vadd.f32 %v1254_v59, %v1045_v40  ;;  %v780_v61 = vpop.f32.mrb[23].mxu0  ;;  %1272 = vmatmul.mubr.bf16.vlgmr.msra.gmra.mrb[16].mxu1 %v801_v53  ;;  %v798_v63 = vmax.f32 %v786_v56, 0.0 }
 0x4ad   :  { %v781_v62 = vadd.f32 %v1045_v40, %v780_v61  ;;  %v796_v1 = vmax.f32 %v778_v58, 0.0 }
 0x4ae   :  { %v799_v0 = vmax.f32 %v789_v60, 0.0 }
 0x4af   :  { %v797_v2 = vmax.f32 %v781_v62, 0.0 }
 0x4b0   :  { %v803_v3 = vpack.c.bf16 %v799_v0, %v798_v63 }
 0x4b1   :  { %v802_v4 = vpack.c.bf16 %v797_v2, %v796_v1 }
 0x4b3   :  { %1275 = vmatprep.mubr.bf16.mxu1 %v802_v4 }
 0x4b4   :  { %1276 = vmatmul.mubr.bf16.gmra.mrb[20].mxu1 %v803_v3 }
 0x57f   :  { %v1273_v6 = vpop.f32.mrb[16].mxu1 }
 0x580   :  { %v917_v7 = vadd.f32 %v1273_v6, %v1054_v5  ;;  %v908_v8 = vpop.f32.mrb[17].mxu1 }
 0x581   :  { %v909_v9 = vadd.f32 %v1054_v5, %v908_v8  ;;  %v1274_v10 = vpop.f32.mrb[18].mxu1 }
 0x582   :  { %v941_v11 = vsub.f32 0.0, %v917_v7  ;;  %v920_v12 = vadd.f32 %v1274_v10, %v1054_v5  ;;  %v911_v13 = vpop.f32.mrb[19].mxu1 }
 0x583   :  { %v939_v14 = vsub.f32 0.0, %v909_v9  ;;  %v912_v15 = vadd.f32 %v1054_v5, %v911_v13 }
 0x584   :  { %v951_v16 = vmul.f32 1.442695, %v941_v11  ;;  %v942_v17 = vsub.f32 0.0, %v920_v12 }
 0x585   :  { %v947_v18 = vmul.f32 1.442695, %v939_v14  ;;  %v940_v19 = vsub.f32 0.0, %v912_v15 }
 0x586   :  { %1335 = vpow2.f32 %v951_v16  ;;  %v953_v20 = vmul.f32 1.442695, %v942_v17 }
 0x587   :  { %1337 = vpow2.f32 %v947_v18  ;;  %v949_v21 = vmul.f32 1.442695, %v940_v19  ;;  %v1277_v22 = vpop.f32.mrb[20].mxu1 }
 0x588   :  { %1339 = vpow2.f32 %v953_v20  ;;  %v933_v23 = vadd.f32 %v1277_v22, %v1054_v5  ;;  %v924_v24 = vpop.f32.mrb[21].mxu1 }
 0x589   :  { %1341 = vpow2.f32 %v949_v21  ;;  %v925_v25 = vadd.f32 %v1054_v5, %v924_v24  ;;  %v1278_v26 = vpop.f32.mrb[22].mxu1 }
 0x58a   :  { %v945_v27 = vsub.f32 0.0, %v933_v23  ;;  %v936_v28 = vadd.f32 %v1278_v26, %v1054_v5  ;;  %v927_v29 = vpop.f32.mrb[23].mxu1 }
 0x58b   :  { %v943_v30 = vsub.f32 0.0, %v925_v25  ;;  %v928_v31 = vadd.f32 %v1054_v5, %v927_v29 }
 0x58c   :  { %v959_v32 = vmul.f32 1.442695, %v945_v27  ;;  %v946_v33 = vsub.f32 0.0, %v936_v28 }
 0x58d   :  { %v955_v34 = vmul.f32 1.442695, %v943_v30  ;;  %v944_v35 = vsub.f32 0.0, %v928_v31 }
 0x58e   :  { %1343 = vpow2.f32 %v959_v32  ;;  %v961_v36 = vmul.f32 1.442695, %v946_v33 }
 0x58f   :  { %1345 = vpow2.f32 %v955_v34  ;;  %v957_v37 = vmul.f32 1.442695, %v944_v35 }
 0x590   :  { %v1336_v38 = vpop.eup %1335  ;;  %1347 = vpow2.f32 %v961_v36 }
 0x591   :  { %v1338_v39 = vpop.eup %1337  ;;  %v965_v40 = vadd.f32 1.0, %v1336_v38  ;;  %1349 = vpow2.f32 %v957_v37 }
 0x592   :  { %v1340_v41 = vpop.eup %1339  ;;  %v963_v42 = vadd.f32 1.0, %v1338_v39 }
 0x593   :  { %v1342_v43 = vpop.eup %1341  ;;  %1351 = vrcp.f32 %v965_v40  ;;  %v966_v44 = vadd.f32 1.0, %v1340_v41 }
 0x594   :  { %1353 = vrcp.f32 %v963_v42  ;;  %v964_v45 = vadd.f32 1.0, %v1342_v43 }
 0x595   :  { %1355 = vrcp.f32 %v966_v44 }
 0x596   :  { %1357 = vrcp.f32 %v964_v45 }
 0x598   :  { %v1344_v46 = vpop.eup %1343 }
 0x599   :  { %v1346_v47 = vpop.eup %1345  ;;  %v969_v48 = vadd.f32 1.0, %v1344_v46 }
 0x59a   :  { %v1348_v49 = vpop.eup %1347  ;;  %v967_v50 = vadd.f32 1.0, %v1346_v47 }
 0x59b   :  { %v1350_v51 = vpop.eup %1349  ;;  %1359 = vrcp.f32 %v969_v48  ;;  %v970_v52 = vadd.f32 1.0, %v1348_v49 }
 0x59c   :  { %1361 = vrcp.f32 %v967_v50  ;;  %v968_v53 = vadd.f32 1.0, %v1350_v51 }
 0x59d   :  { %v1352_v54 = vpop.eup %1351  ;;  %1363 = vrcp.f32 %v970_v52 }
 0x59e   :  { %v1354_v55 = vpop.eup %1353  ;;  %981 = vst [vmem:[#allocation8 + $0x10] sm:$0xff] %v1352_v54  ;;  %1365 = vrcp.f32 %v968_v53 }
 0x59f   :  { %v1356_v56 = vpop.eup %1355  ;;  %979 = vst [vmem:[#allocation8] sm:$0xff] %v1354_v55 }
 0x5a0   :  { %v1358_v57 = vpop.eup %1357  ;;  %982 = vst [vmem:[#allocation8 + $0x18] sm:$0xff] %v1356_v56 }
 0x5a1   :  { %980 = vst [vmem:[#allocation8 + $0x8] sm:$0xff] %v1358_v57 }
 0x5a5   :  { %v1360_v58 = vpop.eup %1359 }
 0x5a6   :  { %v1362_v59 = vpop.eup %1361  ;;  %985 = vst [vmem:[#allocation8 + $0x30] sm:$0xff] %v1360_v58 }
 0x5a7   :  { %v1364_v60 = vpop.eup %1363  ;;  %983 = vst [vmem:[#allocation8 + $0x20] sm:$0xff] %v1362_v59 }
 0x5a8   :  { %v1366_v61 = vpop.eup %1365  ;;  %986 = vst [vmem:[#allocation8 + $0x38] sm:$0xff] %v1364_v60 }
 0x5a9   :  { %984 = vst [vmem:[#allocation8 + $0x28] sm:$0xff] %v1366_v61 }
 0x5aa   :  { %1444 = shalt.err (!%p1441_p0)
}
 0x5ab   :  { %s1445_s21 = scalar_lea.hbm %s1583_s3, 1024 }
 0x5ac   :  { %p1446_p1 = scmp.ne.s32.totalorder %s1583_s3, %s1445_s21  ;;  %p1449_p2 = scmp.lt.u32.totalorder %s1445_s21, %s1583_s3 }
 0x5ae   :  { %p1451_p3 = pnand %p1449_p2, %p1446_p1 }
 0x5b0   :  { %1454 = shalt.err (!%p1451_p3)
}
 0x5b1   :  { %998 = dma.vmem_to_hbm [thread:$0]  %s993_s17, 1024, %s1583_s3, [#allocation4], %s1465_s1, %s1465_s1, %s1466_s13  }
 0x5b2   :  { %1459 = dma.done.wait [#allocation4], 1024  }
 0x5b3   :  { %1460 = vsyncadd [#allocation4], 4294966272 }
 0x5b4   :  { %1006 = vsyncpa [#allocation3], 1 }
 0x5b5   :  { %1007 = vsyncpa [#allocation6], 1 }
 0x5b6   :  { %1008 = vsyncpa [#allocation4], 1 }

</bundles_post_ra>
